<compile_context>
chip_gen: v7x
topology: tpu7x:2x2x1
jax: 0.10.0
libtpu: 0.0.40
codegen_flags: <defaults>
</compile_context>

<pallas_src>
import jax
import jax.numpy as jnp
import numpy as np
from jax.experimental import pallas as pl
from jax.experimental.pallas import tpu as pltpu

EPS = 1e-7
_MAX_TB = 1024          # diminishing returns past ~512-1024 rows per tile


def _round_up(a, b):
    return (a + b - 1) // b * b


def _vmem_capacity_bytes():
    try:
        return int(pltpu.get_tpu_info().vmem_capacity_bytes)
    except Exception:
        return 64 * 1024 * 1024   # conservative fallback (v7x per-TC size)


def _ce_kernel(n_ref, x_ref, y_ref, out_ref):
    """One grid step: a (tb, C) row tile -> one scalar partial sum.

    n_ref   : SMEM (1,) int32    -- true batch size (scalar prefetch)
    x_ref   : VMEM (tb, C)       -- logits tile
    y_ref   : VMEM (tb, C)       -- soft-label tile
    out_ref : SMEM (1, 1) float32-- sum over this tile of y * log(softmax(x)+eps)
    """
    i = pl.program_id(0)
    tb = x_ref.shape[0]

    x = x_ref[...].astype(jnp.float32)
    y = y_ref[...].astype(jnp.float32)

    # Numerically-stable softmax without a division:
    #   P = e / s  =>  log(P + eps) = log(e + eps*s) - log(s)
    m = jnp.max(x, axis=1, keepdims=True)
    e = jnp.exp(x - m)
    s = jnp.sum(e, axis=1, keepdims=True)
    contrib = y * (jnp.log(e + EPS * s) - jnp.log(s))          # (tb, C)

    # Mask rows past the true batch size (tail tile of the cdiv grid). Padded
    # rows may hold garbage, but jnp.where is a select so NaN/inf never leak.
    row = jax.lax.broadcasted_iota(jnp.int32, contrib.shape, 0) + i * tb
    contrib = jnp.where(row < n_ref[0], contrib, 0.0)

    out_ref[0, 0] = jnp.sum(contrib)


def my_cross_entropy(x, y, *, tb=None):
    """Pallas implementation of MyCrossEntropy.forward. x, y: [N, C] (f32/bf16)."""
    N, C = x.shape
    assert y.shape == (N, C)

    x_item = jnp.dtype(x.dtype).itemsize
    y_item = jnp.dtype(y.dtype).itemsize
    # Native sublane tile of the narrower input dtype (f32:8, bf16:16, 8-bit:32).
    sub = {4: 8, 2: 16, 1: 32}.get(min(x_item, y_item), 8)

    # Generation-aware VMEM budgets: 128 MiB chips (v5e/v6e) vs 64 MiB/TC (v7x).
    cap = _vmem_capacity_bytes()
    if cap >= 128 * 1024 * 1024:
        data_budget = 80 * 1024 * 1024
        vmem_limit = 112 * 1024 * 1024
    else:
        data_budget = 36 * 1024 * 1024
        vmem_limit = 48 * 1024 * 1024

    if tb is None:
        # Pipelined data = 2 inputs x 2 double-buffers of a (tb, C) tile.
        bytes_per_row = 2 * C * (x_item + y_item)
        tb = data_budget // max(bytes_per_row, 1)
        tb = max(sub, min(tb, _MAX_TB, _round_up(N, sub)))
        tb = (tb // sub) * sub
    # TODO(synk): for vocab-scale C (>= ~64K) add a class-axis grid dimension
    # with an online logsumexp carry so the floor-sized (sub, C) tile still fits
    # the v7x 64 MiB/TC VMEM budget.

    num_tiles = pl.cdiv(N, tb)
    n_true = jnp.array([N], dtype=jnp.int32)

    partials = pl.pallas_call(
        _ce_kernel,
        out_shape=jax.ShapeDtypeStruct((num_tiles, 1), jnp.float32),
        grid_spec=pltpu.PrefetchScalarGridSpec(
            num_scalar_prefetch=1,
            grid=(num_tiles,),
            in_specs=[
                pl.BlockSpec((tb, C), lambda i, n: (i, 0)),
                pl.BlockSpec((tb, C), lambda i, n: (i, 0)),
            ],
            out_specs=pl.BlockSpec((1, 1), lambda i, n: (i, 0),
                                   memory_space=pltpu.SMEM),
        ),
        compiler_params=pltpu.CompilerParams(
            dimension_semantics=("parallel",),   # independent tiles -> megacore on v7x
            vmem_limit_bytes=vmem_limit,
        ),
    )(n_true, x, y)

    return -jnp.sum(partials) / jnp.float32(N)


def _reference(x, y):
    p = jax.nn.softmax(x.astype(jnp.float32), axis=1)
    return -jnp.mean(jnp.sum(y.astype(jnp.float32) * jnp.log(p + EPS), axis=1), axis=0)


if __name__ == "__main__":
    key = jax.random.PRNGKey(0)
    kx, ky, kx2, ky2 = jax.random.split(key, 4)

    # Case 1: small shapes matching the module's forward (x, y: [batch, classes]).
    N, C = 16, 32
    x = jax.random.normal(kx, (N, C), dtype=jnp.float32)
    labels = jax.random.randint(ky, (N,), 0, C)
    y = jax.nn.one_hot(labels, C, dtype=jnp.float32)

    loss = jax.block_until_ready(my_cross_entropy(x, y))
    ref = jax.block_until_ready(_reference(x, y))
    assert np.allclose(np.asarray(loss), np.asarray(ref), rtol=1e-5, atol=1e-5), (
        loss, ref)

    # Case 2: ragged batch -> exercises the in-kernel tail-row mask (no host pad).
    N2 = 13
    x2 = jax.random.normal(kx2, (N2, C), dtype=jnp.float32)
    y2 = jax.nn.softmax(jax.random.normal(ky2, (N2, C), dtype=jnp.float32), axis=1)

    loss2 = jax.block_until_ready(my_cross_entropy(x2, y2))
    ref2 = jax.block_until_ready(_reference(x2, y2))
    assert np.allclose(np.asarray(loss2), np.asarray(ref2), rtol=1e-5, atol=1e-5), (
        loss2, ref2)

    print("KERNEL_OK")
</pallas_src>

<mosaic_0001>
module attributes {stable_mosaic.version = 11 : i64} {
  func.func @_ce_kernel(%arg0: i32, %arg1: memref<1xi32, #tpu.memory_space<smem>>, %arg2: memref<16x32xf32, #tpu.memory_space<vmem>>, %arg3: memref<16x32xf32, #tpu.memory_space<vmem>>, %arg4: memref<1x1xf32, #tpu.memory_space<smem>>) attributes {dimension_semantics = [#tpu.dimension_semantics<parallel>], iteration_bounds = array<i64: 1>, scalar_prefetch = 1 : i64, scratch_operands = 0 : i64, tpu.core_type = #tpu.core_type<tc>, window_params = [{transform_indices = @transform_0, window_bounds = array<i64: 16, 32>}, {transform_indices = @transform_1, window_bounds = array<i64: 16, 32>}, {transform_indices = @transform_2, window_bounds = array<i64: 1, 1>}]} {
    %c0 = arith.constant 0 : index
    %c0_0 = arith.constant 0 : index
    %0 = vector.load %arg2[%c0, %c0_0] : memref<16x32xf32, #tpu.memory_space<vmem>>, vector<16x32xf32>
    %c0_1 = arith.constant 0 : index
    %c0_2 = arith.constant 0 : index
    %1 = vector.load %arg3[%c0_1, %c0_2] : memref<16x32xf32, #tpu.memory_space<vmem>>, vector<16x32xf32>
    %cst = arith.constant dense<0xFF800000> : vector<16xf32>
    %2 = vector.multi_reduction <maximumf>, %0, %cst [1] : vector<16x32xf32> to vector<16xf32>
    %3 = vector.shape_cast %2 : vector<16xf32> to vector<16x1xf32>
    %4 = vector.broadcast %3 : vector<16x1xf32> to vector<16x32xf32>
    %5 = arith.subf %0, %4 : vector<16x32xf32>
    %6 = math.exp %5 : vector<16x32xf32>
    %cst_3 = arith.constant dense<0.000000e+00> : vector<16xf32>
    %7 = vector.multi_reduction <add>, %6, %cst_3 [1] : vector<16x32xf32> to vector<16xf32>
    %8 = vector.shape_cast %7 : vector<16xf32> to vector<16x1xf32>
    %cst_4 = arith.constant 1.000000e-07 : f32
    %9 = vector.broadcast %cst_4 : f32 to vector<16x1xf32>
    %10 = arith.mulf %9, %8 : vector<16x1xf32>
    %11 = vector.broadcast %10 : vector<16x1xf32> to vector<16x32xf32>
    %12 = arith.addf %6, %11 : vector<16x32xf32>
    %13 = math.log %12 : vector<16x32xf32>
    %14 = math.log %8 : vector<16x1xf32>
    %15 = vector.broadcast %14 : vector<16x1xf32> to vector<16x32xf32>
    %16 = arith.subf %13, %15 : vector<16x32xf32>
    %17 = arith.mulf %1, %16 : vector<16x32xf32>
    %18 = tpu.iota {dimensions = array<i32: 0>} : vector<16x32xi32>
    %c16_i32 = arith.constant 16 : i32
    %19 = arith.muli %arg0, %c16_i32 : i32
    %20 = vector.broadcast %19 : i32 to vector<16x32xi32>
    %21 = arith.addi %18, %20 : vector<16x32xi32>
    %c0_5 = arith.constant 0 : index
    %22 = memref.load %arg1[%c0_5] : memref<1xi32, #tpu.memory_space<smem>>
    %23 = vector.broadcast %22 : i32 to vector<16x32xi32>
    %24 = arith.cmpi slt, %21, %23 : vector<16x32xi32>
    %cst_6 = arith.constant 0.000000e+00 : f32
    %25 = vector.broadcast %cst_6 : f32 to vector<16x32xf32>
    %26 = arith.select %24, %17, %25 : vector<16x32xi1>, vector<16x32xf32>
    %27 = vector.shape_cast %26 : vector<16x32xf32> to vector<1x16x32xf32>
    %cst_7 = arith.constant dense<0.000000e+00> : vector<1xf32>
    %28 = vector.multi_reduction <add>, %27, %cst_7 [1, 2] : vector<1x16x32xf32> to vector<1xf32>
    %29 = vector.shape_cast %28 : vector<1xf32> to vector<1x1x1xf32>
    %30 = vector.extract %29[0, 0, 0] : f32 from vector<1x1x1xf32>
    %c0_8 = arith.constant 0 : index
    %c0_9 = arith.constant 0 : index
    %31 = memref.load %arg4[%c0_8, %c0_9] : memref<1x1xf32, #tpu.memory_space<smem>>
    memref.store %30, %arg4[%c0_8, %c0_9] : memref<1x1xf32, #tpu.memory_space<smem>>
    return
  }
  func.func @transform_0(%arg0: i32, %arg1: memref<1xi32, #tpu.memory_space<smem>>) -> (i32, i32) {
    %c0_i32 = arith.constant 0 : i32
    %c0_i32_0 = arith.constant 0 : i32
    return %arg0, %c0_i32 : i32, i32
  }
  func.func @transform_1(%arg0: i32, %arg1: memref<1xi32, #tpu.memory_space<smem>>) -> (i32, i32) {
    %c0_i32 = arith.constant 0 : i32
    %c0_i32_0 = arith.constant 0 : i32
    return %arg0, %c0_i32 : i32, i32
  }
  func.func @transform_2(%arg0: i32, %arg1: memref<1xi32, #tpu.memory_space<smem>>) -> (i32, i32) {
    %c0_i32 = arith.constant 0 : i32
    %c0_i32_0 = arith.constant 0 : i32
    return %arg0, %c0_i32 : i32, i32
  }
}

</mosaic_0001>

<bundles_post_ra>
// kernel: tpu_custom_call.1
= control target key start
LH: loop header
LB: loop body
LE: loop exit
PB: predicated region body
PF: predicated region fallthrough
CT: control target
= control target key end

     0   :  { %9 = vsyncpa [#allocation5], 0  ;;  %s272_s0 = inlined_call_operand.<no memory space> [shape: s32[1], index: 0, kind: input, shape index: {}]   ;;  %s273_s1 = inlined_call_operand.hbm [shape: f32[16,32], index: 1, kind: input, shape index: {}]   ;;  %s274_s2 = inlined_call_operand.hbm [shape: f32[16,32], index: 2, kind: input, shape index: {}]   ;;  %s275_s3 = inlined_call_operand.hbm [shape: f32[1,1], index: 3, kind: output, shape index: {}]  }
   0x1   :  { %10 = vsyncpa [#allocation8], 0 }
   0x2   :  { %11 = vsyncpa [#allocation6], 0  ;;  %s202_s12 = smov [#allocation4]   ;;  %s142_s16 = scalar_lea.hbm %s273_s1, 256 }
   0x3   :  { %s17_s13 = sshll.u32 %s202_s12, 4  ;;  %p143_p0 = scmp.ne.s32.totalorder %s273_s1, %s142_s16  ;;  %s18_s13 = int_to_ptr.vmem [resolvable:$true] %s17_s13 }
   0x4   :  { %p146_p1 = scmp.lt.u32.totalorder %s142_s16, %s273_s1 }
   0x6   :  { %p148_p2 = pnand %p146_p1, %p143_p0 }
   0x8   :  { %151 = shalt.err (!%p148_p2)
}
   0x9   :  { %s152_s21 = scalar_lea.vmem %s18_s13, 256  ;;  %p157_p4 = scmp.lt.s32.totalorder %s18_s13, %s18_s13 }
   0xa   :  { %p153_p3 = scmp.ne.s32.totalorder %s18_s13, %s152_s21  ;;  %p158_p5 = scmp.lt.s32.totalorder %s152_s21, %s152_s21 }
   0xc   :  { %p159_p6 = por %p158_p5, %p157_p4 }
   0xe   :  { %p160_p7 = pnand %p159_p6, %p153_p3 }
  0x10   :  { %163 = shalt.err (!%p160_p7)
}
  0x11   :  { %s203_s22 = smov 128   ;;  %s204_s23 = smov 8  }
  0x12   :  { %23 = dma.hbm_to_vmem [thread:$0]  %s273_s1, 256, %s18_s13, [#allocation5], %s203_s22, %s203_s22, %s204_s23  }
  0x13   :  { %s205_s26 = smov [#allocation7]   ;;  %s164_s30 = scalar_lea.hbm %s274_s2, 256 }
  0x14   :  { %s29_s27 = sshll.u32 %s205_s26, 4  ;;  %p165_p8 = scmp.ne.s32.totalorder %s274_s2, %s164_s30  ;;  %s30_s27 = int_to_ptr.vmem [resolvable:$true] %s29_s27 }
  0x15   :  { %p168_p9 = scmp.lt.u32.totalorder %s164_s30, %s274_s2 }
  0x17   :  { %p170_p10 = pnand %p168_p9, %p165_p8 }
  0x19   :  { %173 = shalt.err (!%p170_p10)
}
  0x1a   :  { %s174_s8 = scalar_lea.vmem %s30_s27, 256  ;;  %p179_p12 = scmp.lt.s32.totalorder %s30_s27, %s30_s27 }
  0x1b   :  { %p175_p11 = scmp.ne.s32.totalorder %s30_s27, %s174_s8  ;;  %p180_p13 = scmp.lt.s32.totalorder %s174_s8, %s174_s8 }
  0x1d   :  { %p181_p0 = por %p180_p13, %p179_p12 }
  0x1f   :  { %p182_p1 = pnand %p181_p0, %p175_p11 }
  0x21   :  { %185 = shalt.err (!%p182_p1)
}
  0x22   :  { %35 = dma.hbm_to_vmem [thread:$0]  %s274_s2, 256, %s30_s27, [#allocation8], %s203_s22, %s203_s22, %s204_s23  }
  0x23   :  { %196 = dma.done.wait [#allocation5], 256  }
  0x24   :  { %197 = vsyncadd [#allocation5], 4294967040 }
  0x25   :  { %198 = dma.done.wait [#allocation8], 256  }
  0x26   :  { %199 = vsyncadd [#allocation8], 4294967040  ;;  %vm46_vm0 = vcmask 261120   ;;  %v42_v0 = vld [vmem:[#allocation4] sm:$0xff]  ;;  %v43_v1 = vld [vmem:[#allocation4 + $0x8] sm:$0xff]  ;;  %v81_v21 = vlaneseq  ;;  %v89_v29 = vstv %s272_s0  ;;  %s186_s13 = scalar_lea.hbm %s275_s3, 16 }
  0x27   :  { %v47_v2 = vsel %vm46_vm0, %v42_v0, -inf  ;;  %v50_v3 = vsel %vm46_vm0, %v43_v1, -inf  ;;  %v44_v26 = vld [vmem:[#allocation7] sm:$0xff]  ;;  %v45_v35 = vld [vmem:[#allocation7 + $0x8] sm:$0xff]  ;;  %p187_p2 = scmp.ne.s32.totalorder %s275_s3, %s186_s13  ;;  %p190_p3 = scmp.lt.u32.totalorder %s186_s13, %s275_s3 }
  0x28   :  { %48 = vmax.xlane.f32.xlu0 %v47_v2  ;;  %v82_v27 = vshrl.u32 %v81_v21, 7 }
  0x29   :  { %p192_p4 = pnand %p190_p3, %p187_p2 }
  0x2a   :  { %v83_v31 = vadd.s32 8, %v82_v27  ;;  %vm90_vm1 = vcmp.lt.s32.totalorder %v82_v27, %v89_v29 }
  0x2c   :  { %51 = vmax.xlane.f32.xlu0 %v50_v3  ;;  %vm91_vm2 = vcmp.lt.s32.totalorder %v83_v31, %v89_v29 }
  0xb5   :  { %v49_v4 = vpop.xlane.xlu0 %48 }
  0xb6   :  { %v53_v5 = vsub.f32 %v42_v0, %v49_v4 }
  0xb8   :  { %v55_v6 = vmul.f32 1.442695, %v53_v5 }
  0xb9   :  { %v52_v7 = vpop.xlane.xlu0 %51 }
  0xba   :  { %130 = vpow2.f32 %v55_v6  ;;  %v54_v8 = vsub.f32 %v43_v1, %v52_v7 }
  0xbc   :  { %v57_v9 = vmul.f32 1.442695, %v54_v8 }
  0xbe   :  { %132 = vpow2.f32 %v57_v9 }
  0xc4   :  { %v131_v10 = vpop.eup %130 }
  0xc5   :  { %v59_v11 = vsel %vm46_vm0, %v131_v10, 0.0 }
  0xc6   :  { %60 = vadd.xlane.f32.xlu1 %v59_v11 }
  0xc8   :  { %v133_v12 = vpop.eup %132 }
  0xc9   :  { %v62_v13 = vsel %vm46_vm0, %v133_v12, 0.0 }
  0xca   :  { %63 = vadd.xlane.f32.xlu1 %v62_v13 }
 0x153   :  { %v61_v14 = vpop.xlane.xlu1 %60 }
 0x154   :  { %v65_v15 = vmul.f32 1e-07, %v61_v14  ;;  %134 = vlog2.f32 %v61_v14 }
 0x156   :  { %v67_v16 = vadd.f32 %v131_v10, %v65_v15 }
 0x157   :  { %v64_v17 = vpop.xlane.xlu1 %63 }
 0x158   :  { %136 = vlog2.f32 %v67_v16  ;;  %v66_v18 = vmul.f32 1e-07, %v64_v17 }
 0x159   :  { %138 = vlog2.f32 %v64_v17 }
 0x15a   :  { %v68_v19 = vadd.f32 %v133_v12, %v66_v18 }
 0x15c   :  { %140 = vlog2.f32 %v68_v19 }
 0x15e   :  { %v135_v20 = vpop.eup %134 }
 0x15f   :  { %v74_v24 = vmul.f32 0.6931472, %v135_v20 }
 0x162   :  { %v137_v22 = vpop.eup %136 }
 0x163   :  { %v70_v23 = vmul.f32 0.6931472, %v137_v22  ;;  %v139_v25 = vpop.eup %138 }
 0x164   :  { %v76_v33 = vmul.f32 0.6931472, %v139_v25 }
 0x165   :  { %v77_v28 = vsub.f32 %v70_v23, %v74_v24 }
 0x166   :  { %v141_v30 = vpop.eup %140 }
 0x167   :  { %v72_v32 = vmul.f32 0.6931472, %v141_v30  ;;  %v79_v34 = vmul.f32 %v77_v28, %v44_v26 }
 0x169   :  { %v78_v36 = vsub.f32 %v72_v32, %v76_v33  ;;  %v92_v38 = vsel %vm90_vm1, %v79_v34, 0.0 }
 0x16a   :  { %v94_v40 = vsel %vm46_vm0, %v92_v38, 0.0 }
 0x16b   :  { %v80_v37 = vmul.f32 %v78_v36, %v45_v35 }
 0x16d   :  { %v93_v39 = vsel %vm91_vm2, %v80_v37, 0.0 }
 0x16e   :  { %v95_v41 = vsel %vm46_vm0, %v93_v39, 0.0 }
 0x16f   :  { %v96_v42 = vadd.f32 %v95_v41, %v94_v40 }
 0x171   :  { %97 = vadd.xlane.f32.xlu0 %v96_v42 }
 0x1fe   :  { %v98_v43 = vpop.xlane.xlu0 %97 }
 0x1ff   :  { %v99_v44 = vrot.slane %v98_v43, 4 }
 0x201   :  { %v100_v45 = vadd.f32 %v99_v44, %v98_v43 }
 0x203   :  { %v101_v46 = vrot.slane %v100_v45, 2 }
 0x205   :  { %v102_v47 = vadd.f32 %v101_v46, %v100_v45 }
 0x207   :  { %v103_v48 = vrot.slane %v102_v47, 1 }
 0x209   :  { %v104_v49 = vadd.f32 %v103_v48, %v102_v47 }
 0x20b   :  { %123 = vpush %v104_v49 }
 0x23c   :  { %s124_s0 = spop %123 }
 0x23d   :  { %107 = sst [smem:[#allocation9]] %s124_s0 }
 0x23e   :  { %195 = shalt.err (!%p192_p4)
}
 0x23f   :  { %s206_s18 = smov [#allocation9]  }
 0x240   :  { %115 = dma.smem_to_hbm %s206_s18, 16, %s275_s3, [#allocation6]  }
 0x241   :  { %200 = dma.done.wait [#allocation6], 16  }
 0x242   :  { %201 = vsyncadd [#allocation6], 4294967280 }
 0x243   :  { %119 = sfence }
 0x244   :  { %120 = vsyncpa [#allocation5], 1 }
 0x245   :  { %121 = vsyncpa [#allocation8], 1 }
 0x246   :  { %122 = vsyncpa [#allocation6], 1 }

</bundles_post_ra>
